<compile_context>
chip_gen: v6e
topology: v6e:2x2x1
jax: 0.10.0
libtpu: 0.0.40
codegen_flags: <defaults>
</compile_context>

<pallas_src>
import functools

import jax
import jax.numpy as jnp
import numpy as np
from jax.experimental import pallas as pl
from jax.experimental.pallas import tpu as pltpu

RC = 128      # flattened-spatial row chunk processed per inner iteration
GUARD = 32    # zero guard rows above/below the recurrent h buffer


def _round_up(n, m):
    return ((n + m - 1) // m) * m


def _tap_shifts(K, pad, Wp):
    # Flattened-row offset of each "same"-conv tap (dy, dx), row-major.
    return [(dy - pad) * Wp + (dx - pad) for dy in range(K) for dx in range(K)]


# ----------------------------------------------------------------------------
# Kernel 1: non-recurrent, hoisted x-projection  gx = im2col(x) @ Wx + bias.
# Plain tiled matmul with M in the thousands -> high MXU utilization.
# ----------------------------------------------------------------------------
def _gate_proj_kernel(x_ref, w_ref, b_ref, o_ref):
    o_ref[...] = (
        jnp.dot(x_ref[...].astype(jnp.bfloat16), w_ref[...],
                preferred_element_type=jnp.float32)
        + b_ref[...])


def gate_projection(xtaps, wx, b):
    """xtaps: (M, Kc_pad) f32; wx: (Kc_pad, 4*Cout) bf16; b: (1, 4*Cout) f32."""
    M, Kc = xtaps.shape
    N = wx.shape[-1]
    tm = next(t for t in (512, 256, 128) if M % t == 0)
    return pl.pallas_call(
        _gate_proj_kernel,
        out_shape=jax.ShapeDtypeStruct((M, N), jnp.float32),
        grid_spec=pltpu.PrefetchScalarGridSpec(
            num_scalar_prefetch=0,
            grid=(M // tm,),
            in_specs=[
                pl.BlockSpec((tm, Kc), lambda i: (i, 0)),
                pl.BlockSpec((Kc, N), lambda i: (0, 0)),
                pl.BlockSpec((1, N), lambda i: (0, 0)),
            ],
            out_specs=pl.BlockSpec((tm, N), lambda i: (i, 0)),
        ),
        compiler_params=pltpu.CompilerParams(
            dimension_semantics=("parallel",)),
    )(xtaps, wx, b)


# ----------------------------------------------------------------------------
# Kernel 2: recurrent ConvLSTM sweep.  One timestep of one batch element per
# grid step; h/c carried in VMEM scratch across the "arbitrary" time axis.
# ----------------------------------------------------------------------------
def _convlstm_step_kernel(gx_ref, wh_ref, wc_ref, ring_ref, out_ref,
                          hbuf_ref, c_ref, hstage_ref, *,
                          Wp, HWp_pad, K, pad, Cout):
    """Layouts (channels-last, zero-ring-padded, flattened spatial rows):
      gx_ref    (1, 1, HWp_pad, 4*Cout)  f32  hoisted x-projection + bias
      wh_ref    (K*K*Cout, 4*Cout)       bf16 fused h-path weights [i,f,c,o]
      wc_ref    (3, HWp_pad, Cout)       f32  peepholes Wci, Wcf, Wco
      ring_ref  (HWp_pad, Cout)          f32  1 inside the image else 0
      out_ref   (1, 1, HWp_pad, Cout)    f32
      scratch:  hbuf (HWp_pad + 2*GUARD, Cout) f32  h_{t-1} with zero guards
                c    (HWp_pad, Cout)            f32  cell state
                hstage (HWp_pad, Cout)          f32  h_t staging (so every
                                                     chunk reads pure h_{t-1})
    """
    t = pl.program_id(1)
    n_chunks = HWp_pad // RC
    shifts = _tap_shifts(K, pad, Wp)

    @pl.when(t == 0)
    def _():
        hbuf_ref[...] = jnp.zeros_like(hbuf_ref)
        c_ref[...] = jnp.zeros_like(c_ref)

    for r in range(n_chunks):
        base = GUARD + r * RC
        rsl = pl.ds(r * RC, RC)

        # Fused conv taps: static slices of the guard-padded h_{t-1} buffer,
        # lane-concatenated into one (RC, K*K*Cout) bf16 MXU operand.  The
        # guard rows absorb all shifts; ring/tail rows of h are kept at zero,
        # so interior rows see exact zero-padded "same" convolution.
        taps = jnp.concatenate(
            [hbuf_ref[pl.ds(base + s, RC), :] for s in shifts],
            axis=-1).astype(jnp.bfloat16)

        acc = gx_ref[0, 0, rsl, :] + jnp.dot(
            taps, wh_ref[...], preferred_element_type=jnp.float32)

        c_prev = c_ref[rsl]
        i_t = jax.nn.sigmoid(acc[:, 0 * Cout:1 * Cout]
                             + wc_ref[0, rsl] * c_prev)
        f_t = jax.nn.sigmoid(acc[:, 1 * Cout:2 * Cout]
                             + wc_ref[1, rsl] * c_prev)
        c_new = f_t * c_prev + i_t * jnp.tanh(acc[:, 2 * Cout:3 * Cout])
        o_t = jax.nn.sigmoid(acc[:, 3 * Cout:4 * Cout]
                             + wc_ref[2, rsl] * c_new)
        # Re-zero the pad ring / tail rows of h so the next step's taps (and
        # the next layer's input) see exact zero padding.
        h_new = o_t * jnp.tanh(c_new) * ring_ref[rsl]

        c_ref[rsl] = c_new
        hstage_ref[rsl] = h_new            # staged: later chunks read h_{t-1}
        out_ref[0, 0, rsl, :] = h_new

    # Commit h_t into the guarded recurrent buffer for step t+1.
    hbuf_ref[pl.ds(GUARD, HWp_pad), :] = hstage_ref[...]


def convlstm_recurrent(gx, wh, wc, ring, *, Wp, HWp_pad, K, pad, Cout):
    """gx: (B, T, HWp_pad, 4*Cout).  Returns (B, T, HWp_pad, Cout)."""
    B, T = gx.shape[0], gx.shape[1]
    assert HWp_pad % RC == 0
    assert GUARD >= pad * Wp + pad        # guard rows absorb every tap shift

    kernel = functools.partial(_convlstm_step_kernel, Wp=Wp, HWp_pad=HWp_pad,
                               K=K, pad=pad, Cout=Cout)
    return pl.pallas_call(
        kernel,
        out_shape=jax.ShapeDtypeStruct((B, T, HWp_pad, Cout), jnp.float32),
        grid_spec=pltpu.PrefetchScalarGridSpec(
            num_scalar_prefetch=0,
            grid=(B, T),
            in_specs=[
                pl.BlockSpec((1, 1, HWp_pad, 4 * Cout),
                             lambda b, t: (b, t, 0, 0)),
                pl.BlockSpec((K * K * Cout, 4 * Cout), lambda b, t: (0, 0)),
                pl.BlockSpec((3, HWp_pad, Cout), lambda b, t: (0, 0, 0)),
                pl.BlockSpec((HWp_pad, Cout), lambda b, t: (0, 0)),
            ],
            out_specs=pl.BlockSpec((1, 1, HWp_pad, Cout),
                                   lambda b, t: (b, t, 0, 0)),
            scratch_shapes=[
                pltpu.VMEM((HWp_pad + 2 * GUARD, Cout), jnp.float32),  # h_{t-1}
                pltpu.VMEM((HWp_pad, Cout), jnp.float32),              # c
                pltpu.VMEM((HWp_pad, Cout), jnp.float32),              # h_t stage
            ],
        ),
        # batch -> both v7x TensorCores; time axis is the sequential carry.
        compiler_params=pltpu.CompilerParams(
            dimension_semantics=("parallel", "arbitrary")),
    )(gx, wh, wc, ring)


# ----------------------------------------------------------------------------
# Parameter init (PyTorch shapes) + conversion to the fused kernel layout.
# ----------------------------------------------------------------------------
def init_lstm_main_params(key, full_channel_list, K, H=16, W=16):
    """Deterministic params, PyTorch shapes. Gate order [i, f, c, o]."""
    params = []
    for l in range(len(full_channel_list) - 1):
        Cin, Cout = full_channel_list[l], full_channel_list[l + 1]
        kx = 1.0 / np.sqrt(Cin * K * K)
        kh = 1.0 / np.sqrt(Cout * K * K)
        keys = jax.random.split(key, 16)
        key = keys[0]
        wx = [jax.random.uniform(keys[1 + g], (Cout, Cin, K, K),
                                 jnp.float32, -kx, kx) for g in range(4)]
        wh = [jax.random.uniform(keys[5 + g], (Cout, Cout, K, K),
                                 jnp.float32, -kh, kh) for g in range(4)]
        bh = [jax.random.uniform(keys[9 + g], (Cout,),
                                 jnp.float32, -kh, kh) for g in range(4)]
        # Wci, Wcf, Wco are (1, Cout, 16, 16) in the module (zeros there;
        # small randoms here to exercise the peephole path).
        wc = [0.1 * jax.random.normal(keys[13 + g], (1, Cout, H, W),
                                      jnp.float32) for g in range(3)]
        params.append({"wx": wx, "wh": wh, "bh": bh, "wc": wc})
    return params


def _to_kernel_params(p, K, H, W, pad, HWp_pad):
    Cout, Cin = p["wx"][0].shape[0], p["wx"][0].shape[1]
    Hp, Wp = H + 2 * pad, W + 2 * pad
    HWp = Hp * Wp
    KK = K * K

    # Hoisted x-path weights, fused over taps and gates:
    # (KK*Cin, 4*Cout), rows zero-padded to a multiple of 64 (aligned MXU
    # contraction; zero columns are numerically free).
    wx = jnp.concatenate(
        [jnp.transpose(wg, (2, 3, 1, 0)).reshape(KK, Cin, Cout)
         for wg in p["wx"]], axis=-1).reshape(KK * Cin, 4 * Cout)
    kc_pad = _round_up(KK * Cin, 64)
    wx = jnp.pad(wx, ((0, kc_pad - KK * Cin), (0, 0))).astype(jnp.bfloat16)

    # Recurrent h-path weights, fused over taps and gates: (KK*Cout, 4*Cout).
    # Row index = tap*Cout + channel, matching the in-kernel tap concat order.
    wh = jnp.concatenate(
        [jnp.transpose(wg, (2, 3, 1, 0)).reshape(KK, Cout, Cout)
         for wg in p["wh"]], axis=-1).reshape(KK * Cout, 4 * Cout)
    wh = wh.astype(jnp.bfloat16)

    b = jnp.concatenate(p["bh"], axis=0)[None, :].astype(jnp.float32)

    # Peepholes in padded flattened-spatial layout (zero on ring/tail rows).
    wcs = []
    for wg in p["wc"]:
        hwc = jnp.transpose(wg[0], (1, 2, 0))                  # (H, W, Cout)
        hwc = jnp.pad(hwc, ((pad, pad), (pad, pad), (0, 0)))
        flat = hwc.reshape(HWp, Cout)
        flat = jnp.pad(flat, ((0, HWp_pad - HWp), (0, 0)))
        wcs.append(flat)
    wc = jnp.stack(wcs, axis=0)                                # (3, HWp_pad, C)

    # Interior (non-ring, non-tail) mask, pre-broadcast along channels.
    yy, xx = np.meshgrid(np.arange(Hp), np.arange(Wp), indexing="ij")
    interior = ((yy >= pad) & (yy < Hp - pad)
                & (xx >= pad) & (xx < Wp - pad)).reshape(-1)
    ring_np = np.zeros((HWp_pad,), np.float32)
    ring_np[:HWp] = interior.astype(np.float32)
    ring = jnp.asarray(np.ascontiguousarray(
        np.broadcast_to(ring_np[:, None], (HWp_pad, Cout))))
    return {"wx": wx, "wh": wh, "b": b, "wc": wc, "ring": ring}


# ----------------------------------------------------------------------------
# LSTMmain.forward equivalent (copy_bool / copy_out all False).
# ----------------------------------------------------------------------------
def lstm_main_forward(x_nchw, torch_params, K):
    """x_nchw: (B, T, C, H, W) -> ((B, T, Cout_last, H, W), [])."""
    B, T, C, H, W = x_nchw.shape
    pad = (K - 1) // 2
    Hp, Wp = H + 2 * pad, W + 2 * pad
    HWp = Hp * Wp
    HWp_pad = _round_up(HWp, RC)
    shifts = _tap_shifts(K, pad, Wp)

    # channels-last, zero spatial ring, flattened rows, zero tail rows.
    x = jnp.transpose(x_nchw, (0, 1, 3, 4, 2))
    x = jnp.pad(x, ((0, 0), (0, 0), (pad, pad), (pad, pad), (0, 0)))
    x = x.reshape(B, T, HWp, C)
    x = jnp.pad(x, ((0, 0), (0, 0), (0, HWp_pad - HWp), (0, 0)))

    for p in torch_params:
        kp = _to_kernel_params(p, K, H, W, pad, HWp_pad)
        Cin = x.shape[-1]
        Cout = kp["wh"].shape[1] // 4
        kc = K * K * Cin
        kc_pad = kp["wx"].shape[0]

        # ---- hoisted, non-recurrent x-projection:  gx = conv_x(x) + bias ----
        # Tap gather (im2col along the flattened padded rows) is done once per
        # layer outside the recurrence; wrap-around rows only affect ring/tail
        # outputs, which are never consumed downstream.
        xtaps = jnp.concatenate([jnp.roll(x, -s, axis=2) for s in shifts],
                                axis=-1)                   # (B,T,HWp_pad,KK*Cin)
        xtaps = jnp.pad(xtaps, ((0, 0), (0, 0), (0, 0), (0, kc_pad - kc)))
        gx = gate_projection(xtaps.reshape(B * T * HWp_pad, kc_pad),
                             kp["wx"], kp["b"])
        gx = gx.reshape(B, T, HWp_pad, 4 * Cout)

        # ---- recurrent sweep: only the h-path matmul is inside the loop ----
        x = convlstm_recurrent(gx, kp["wh"], kp["wc"], kp["ring"],
                               Wp=Wp, HWp_pad=HWp_pad, K=K, pad=pad, Cout=Cout)

    Cout = x.shape[-1]
    x = x[:, :, :HWp, :].reshape(B, T, Hp, Wp, Cout)
    x = x[:, :, pad:pad + H, pad:pad + W, :]
    x_out = jnp.transpose(x, (0, 1, 4, 2, 3))
    internal_outputs = []   # copy_out = [False, ...] => nothing copied out
    return x_out, internal_outputs


# ----------------------------------------------------------------------------
# Pure-JAX reference (mirrors the PyTorch module exactly) for validation.
# ----------------------------------------------------------------------------
def _conv2d_same(x, w, b=None):
    out = jax.lax.conv_general_dilated(
        x, w, window_strides=(1, 1), padding="SAME",
        dimension_numbers=("NCHW", "OIHW", "NCHW"))
    if b is not None:
        out = out + b[None, :, None, None]
    return out


def lstm_main_reference(x, torch_params, K):
    B, T, C, H, W = x.shape
    for p in torch_params:
        Cout = p["wx"][0].shape[0]
        h = jnp.zeros((B, Cout, H, W), jnp.float32)
        c = jnp.zeros((B, Cout, H, W), jnp.float32)
        wci, wcf, wco = p["wc"]
        outs = []
        for t in range(T):
            xt = x[:, t]
            i_t = jax.nn.sigmoid(_conv2d_same(xt, p["wx"][0])
                                 + _conv2d_same(h, p["wh"][0], p["bh"][0])
                                 + wci * c)
            f_t = jax.nn.sigmoid(_conv2d_same(xt, p["wx"][1])
                                 + _conv2d_same(h, p["wh"][1], p["bh"][1])
                                 + wcf * c)
            c = f_t * c + i_t * jnp.tanh(_conv2d_same(xt, p["wx"][2])
                                         + _conv2d_same(h, p["wh"][2],
                                                        p["bh"][2]))
            o_t = jax.nn.sigmoid(_conv2d_same(xt, p["wx"][3])
                                 + _conv2d_same(h, p["wh"][3], p["bh"][3])
                                 + wco * c)
            h = o_t * jnp.tanh(c)
            outs.append(h)
        x = jnp.stack(outs, axis=1)
    return x


if __name__ == "__main__":
    key = jax.random.PRNGKey(0)
    B, T, Cin, H, W = 2, 8, 4, 16, 16     # H=W=16 fixed by Wci/Wcf/Wco shapes
    K = 3
    hidden_channel_structure = [32, 32]   # two ConvLSTM layers, 4*Cout = 128
    full_channel_list = [Cin] + hidden_channel_structure

    key, pkey, xkey = jax.random.split(key, 3)
    torch_params = init_lstm_main_params(pkey, full_channel_list, K, H, W)
    x = jax.random.normal(xkey, (B, T, Cin, H, W), jnp.float32)

    out, internal_outputs = lstm_main_forward(x, torch_params, K)
    out = jax.block_until_ready(out)

    assert out.shape == (B, T, hidden_channel_structure[-1], H, W), out.shape

    ref = jax.block_until_ready(lstm_main_reference(x, torch_params, K))
    # MXU operands are bf16 (f32 accumulation); elementwise gate math is f32.
    np.testing.assert_allclose(np.asarray(out), np.asarray(ref),
                               atol=3e-2, rtol=3e-2)
    print("KERNEL_OK")
</pallas_src>

<mosaic_0001>
module attributes {stable_mosaic.version = 11 : i64} {
  func.func @_gate_proj_kernel(%arg0: i32, %arg1: memref<512x64xf32, #tpu.memory_space<vmem>>, %arg2: memref<64x128xbf16, #tpu.memory_space<vmem>>, %arg3: memref<1x128xf32, #tpu.memory_space<vmem>>, %arg4: memref<512x128xf32, #tpu.memory_space<vmem>>) attributes {dimension_semantics = [#tpu.dimension_semantics<parallel>], iteration_bounds = array<i64: 12>, scalar_prefetch = 0 : i64, scratch_operands = 0 : i64, tpu.core_type = #tpu.core_type<tc>, window_params = [{transform_indices = @transform_0, window_bounds = array<i64: 512, 64>}, {pipeline_mode = #tpu.pipeline_mode<synchronous>, transform_indices = @transform_1, window_bounds = array<i64: 64, 128>}, {pipeline_mode = #tpu.pipeline_mode<synchronous>, transform_indices = @transform_2, window_bounds = array<i64: 1, 128>}, {transform_indices = @transform_3, window_bounds = array<i64: 512, 128>}]} {
    %c0 = arith.constant 0 : index
    %c0_0 = arith.constant 0 : index
    %0 = vector.load %arg1[%c0, %c0_0] : memref<512x64xf32, #tpu.memory_space<vmem>>, vector<512x64xf32>
    %1 = arith.truncf %0 : vector<512x64xf32> to vector<512x64xbf16>
    %c0_1 = arith.constant 0 : index
    %c0_2 = arith.constant 0 : index
    %2 = vector.load %arg2[%c0_1, %c0_2] : memref<64x128xbf16, #tpu.memory_space<vmem>>, vector<64x128xbf16>
    %cst = arith.constant dense<0.000000e+00> : vector<512x128xf32>
    %3 = tpu.matmul %1, %2, %cst {dimension_numbers = #tpu.dot_dimension_numbers<[1], [0], [0], [1], [0, 0, 1, 1], [], []>} : vector<512x64xbf16>, vector<64x128xbf16>, vector<512x128xf32> -> vector<512x128xf32>
    %c0_3 = arith.constant 0 : index
    %c0_4 = arith.constant 0 : index
    %4 = vector.load %arg3[%c0_3, %c0_4] : memref<1x128xf32, #tpu.memory_space<vmem>>, vector<1x128xf32>
    %5 = vector.broadcast %4 : vector<1x128xf32> to vector<512x128xf32>
    %6 = arith.addf %3, %5 : vector<512x128xf32>
    %c0_5 = arith.constant 0 : index
    %c0_6 = arith.constant 0 : index
    %7 = vector.load %arg4[%c0_5, %c0_6] : memref<512x128xf32, #tpu.memory_space<vmem>>, vector<512x128xf32>
    tpu.vector_store %arg4[%c0_5, %c0_6], %6 {strides = array<i32>} : memref<512x128xf32, #tpu.memory_space<vmem>>, vector<512x128xf32>,
    return
  }
  func.func @transform_0(%arg0: i32) -> (i32, i32) {
    %c0_i32 = arith.constant 0 : i32
    %c0_i32_0 = arith.constant 0 : i32
    return %arg0, %c0_i32 : i32, i32
  }
  func.func @transform_1(%arg0: i32) -> (i32, i32) {
    %c0_i32 = arith.constant 0 : i32
    %c0_i32_0 = arith.constant 0 : i32
    %c0_i32_1 = arith.constant 0 : i32
    return %c0_i32, %c0_i32_0 : i32, i32
  }
  func.func @transform_2(%arg0: i32) -> (i32, i32) {
    %c0_i32 = arith.constant 0 : i32
    %c0_i32_0 = arith.constant 0 : i32
    %c0_i32_1 = arith.constant 0 : i32
    return %c0_i32, %c0_i32_0 : i32, i32
  }
  func.func @transform_3(%arg0: i32) -> (i32, i32) {
    %c0_i32 = arith.constant 0 : i32
    %c0_i32_0 = arith.constant 0 : i32
    return %arg0, %c0_i32 : i32, i32
  }
}

</mosaic_0001>

<bundles_post_ra>
// kernel: tpu_custom_call.1
= control target key start
LH: loop header
LB: loop body
LE: loop exit
PB: predicated region body
PF: predicated region fallthrough
CT: control target
= control target key end

     0   :  { %8 = vsyncpa [#allocation3], 0  ;;  %s1481_s0 = inlined_call_operand.vmem [shape: f32[6144,64], index: 0, kind: input, shape index: {}]   ;;  %s1482_s1 = inlined_call_operand.vmem [shape: bf16[64,128], index: 1, kind: input, shape index: {}]   ;;  %s1483_s2 = inlined_call_operand.vmem [shape: f32[1,128], index: 2, kind: input, shape index: {}]   ;;  %s1484_s3 = inlined_call_operand.hbm [shape: f32[6144,128], index: 3, kind: output, shape index: {}]  }
   0x1   :  { %10 = vsyncpa [#allocation3 + $0x1], 0  ;;  %s1130_s12 = smov 0   ;;  %s1132_s13 = smov 0  }
   0x2   :  { %s1134_s14 = smov 0   ;;  %s1136_s15 = smov 0  }
   0x3 LB: > { %s1151_s16 = sadd.s32 4294967295, %s1105_s15   ;;  %s834_s17 = sadd.s32 4294967294, %s1105_s15   ;;  %s1105_s15 = sphi %s1136_s15, %s1490_s15   ;;  %s1101_s14 = sphi %s1134_s14, %s1489_s14   ;;  %s1097_s13 = sphi %s1132_s13, %s1488_s13   ;;  %s1093_s12 = sphi %s1130_s12, %s1487_s12  }
   0x4   : > { %s1155_s18 = sadd.s32 1, %s1105_s15   ;;  %s91_s19 = sadd.s32 1, %s1101_s14 }
   0x5   : > { %s88_s20 = ssub.s32 %s1105_s15, %s1155_s18  ;;  %p101_p0 = scmp.ne.s32.totalorder %s1101_s14, %s1097_s13 }
   0x6   : > { %p89_p1 = scmp.eq.s32.totalorder %s88_s20, 0  ;;  %p102_p2 = scmp.eq.s32.totalorder %s1151_s16, 11 }
   0x7   : > { %p107_p3 = scmp.ne.s32.totalorder %s1097_s13, %s1093_s12  ;;  %p108_p4 = scmp.eq.s32.totalorder %s834_s17, 11 }
   0x8   : > { %s1166_s21 = scalar_select %p89_p1, %s1101_s14, %s91_s19  }
   0x9   : > { %p1168_p5 = por %p102_p2, %p101_p0  ;;  %p1172_p6 = por %p108_p4, %p107_p3 }
   0xa   : > { %p837_p7 = scmp.ge.s32.totalorder %s1105_s15, 1  ;;  %p141_p8 = scmp.lt.s32.totalorder %s1105_s15, 13 }
   0xc   : > { %p142_p9 = pnand %p837_p7, %p141_p8 }
   0xd   : > { %s839_s26 = sshll.u32 (!%p142_p9), %s1151_s16, 6  ;;  %s162_s10 = sand.u32 (!%p142_p9), 1, %s1097_s13  }
   0xe   : > { %145 = sbr.rel (%p142_p9) target bundleno = 307 (0x133), region = 32  ;;  %p166_p10 = scmp.lt.s32.totalorder (!%p142_p9), %s839_s26, 767 }
   0xf   : > { %s838_s11 = sshll.u32 (!%p142_p9), %s162_s10, 9  ;;  %s883_s24 = sshll.u32 (!%p142_p9), %s1151_s16, 13 }
  0x10   : > { %s1302_s20 = scalar_lea.vmem (!%p142_p9), [#allocation2], %s838_s11  ;;  %s1429_s28 = scalar_lea.hbm (!%p142_p9), %s1484_s3, %s883_s24 }
  0x11   : > { %s772_s25 = sshll.u32 (!%p142_p9), %s1302_s20, 4  ;;  %s1441_s16 = scalar_lea.sflag (!%p142_p9), [#allocation3], %s162_s10  ;;  %s1431_s25 = int_to_ptr.vmem [resolvable:$true] %s772_s25 }
  0x12   : > { %s1045_s29 = scalar_lea.vmem (!%p142_p9), %s1431_s25, 8192  ;;  %s1107_s30 = smov (!%p142_p9), [#allocation2]  }
  0x13   : > { %v1041_v0 = vld [vmem:[%s1482_s1 + $0x18] sm:$0xff]   ;;  %v1042_v1 = vld [vmem:[%s1482_s1 + $0x10] sm:$0xff]   ;;  %s1492_s26 = smov (!%p166_p10, %s839_s26), 767  ;;  %v1043_v2 = vld [vmem:[%s1482_s1 + $0x8] sm:$0xff]   ;;  %vm308_vm0 = vcmask 523264   ;;  %p1046_p11 = scmp.ne.s32.totalorder %s1431_s25, %s1045_s29 }
  0x14   : > { %920 = vmatprep.subr.bf16.mxu0 %v1041_v0  ;;  %992 = vmatprep.subr.bf16.mxu1 %v1041_v0  ;;  %s840_s4 = sshll.u32 %s1492_s26, 3  ;;  %v1044_v6 = vld [vmem:[%s1482_s1] sm:$0xff]  }
  0x15   : > { %921 = vmatpush3.bf16.msra.mxu0 %v1041_v0  ;;  %996 = vmatpush3.bf16.msra.mxu1 %v1041_v0  ;;  %s1191_s7 = scalar_lea.vmem %s1481_s0, %s840_s4  ;;  %p1047_p12 = pnand %p1046_p11, %p1168_p5 }
  0x16   : > { %922 = vmatprep.subr.bf16.mxu0 %v1042_v1  ;;  %993 = vmatprep.subr.bf16.mxu1 %v1042_v1  ;;  %v173_v3 = vld [vmem:[%s1191_s7] sm:$0xff]  ;;  %v174_v4 = vld [vmem:[%s1191_s7 + $0x8] sm:$0xff]  ;;  %v175_v10 = vld [vmem:[%s1191_s7 + $0x10] sm:$0xff]  ;;  %s1049_s4 = sshll.u32 %s1107_s30, 4  ;;  %s1050_s4 = int_to_ptr.vmem [resolvable:$false] %s1049_s4 }
  0x17   : > { %v205_v5 = vld [vmem:[%s1191_s7 + $0x100] sm:$0xff]  ;;  %v237_v7 = vpack.c.bf16 %v174_v4, %v173_v3  ;;  %v206_v8 = vld [vmem:[%s1191_s7 + $0x108] sm:$0xff]  ;;  %v176_v11 = vld [vmem:[%s1191_s7 + $0x18] sm:$0xff]  ;;  %p1048_p13 = pneg %p1047_p12  ;;  %s1051_s5 = scalar_lea.vmem %s1050_s4, 16384 }
  0x18   : > { %v253_v9 = vpack.c.bf16 %v206_v8, %v205_v5  ;;  %v207_v12 = vld [vmem:[%s1191_s7 + $0x110] sm:$0xff]  ;;  %v208_v13 = vld [vmem:[%s1191_s7 + $0x118] sm:$0xff]  ;;  %v177_v14 = vld [vmem:[%s1191_s7 + $0x20] sm:$0xff]  ;;  %v238_v18 = vpack.c.bf16 %v176_v11, %v175_v10  ;;  %p1052_p0 = scmp.lt.s32.totalorder %s1431_s25, %s1050_s4  ;;  %p1053_p1 = scmp.lt.s32.totalorder %s1051_s5, %s1045_s29 }
  0x19   : > { %923 = vmatpush3.bf16.msra.mxu0 %v1042_v1  ;;  %997 = vmatpush3.bf16.msra.mxu1 %v1042_v1  ;;  %v178_v15 = vld [vmem:[%s1191_s7 + $0x28] sm:$0xff]  ;;  %v209_v16 = vld [vmem:[%s1191_s7 + $0x120] sm:$0xff]  ;;  %v254_v19 = vpack.c.bf16 %v208_v13, %v207_v12  ;;  %v179_v22 = vld [vmem:[%s1191_s7 + $0x30] sm:$0xff] }
  0x1a   : > { %924 = vmatprep.subr.bf16.mxu0 %v1043_v2  ;;  %994 = vmatprep.subr.bf16.mxu1 %v1043_v2  ;;  %v210_v17 = vld [vmem:[%s1191_s7 + $0x128] sm:$0xff]  ;;  %v239_v20 = vpack.c.bf16 %v178_v15, %v177_v14  ;;  %v180_v23 = vld [vmem:[%s1191_s7 + $0x38] sm:$0xff]  ;;  %v211_v24 = vld [vmem:[%s1191_s7 + $0x130] sm:$0xff]  ;;  %p1054_p2 = por %p1053_p1, %p1052_p0 }
  0x1b   : > { %928 = vmatprep.mubr.msk.bf16.mxu0 %vm308_vm0, %v237_v7  ;;  %960 = vmatprep.mubr.msk.bf16.mxu1 %vm308_vm0, %v253_v9  ;;  %v255_v21 = vpack.c.bf16 %v210_v17, %v209_v16  ;;  %v212_v25 = vld [vmem:[%s1191_s7 + $0x138] sm:$0xff]  ;;  %v181_v26 = vld [vmem:[%s1191_s7 + $0x40] sm:$0xff]  ;;  %v182_v27 = vld [vmem:[%s1191_s7 + $0x48] sm:$0xff]  ;;  %v240_v30 = vpack.c.bf16 %v180_v23, %v179_v22 }
  0x1c   : > { %v213_v28 = vld [vmem:[%s1191_s7 + $0x140] sm:$0xff]  ;;  %v214_v29 = vld [vmem:[%s1191_s7 + $0x148] sm:$0xff]  ;;  %v256_v31 = vpack.c.bf16 %v212_v25, %v211_v24  ;;  %v241_v32 = vpack.c.bf16 %v182_v27, %v181_v26  ;;  %v183_v34 = vld [vmem:[%s1191_s7 + $0x50] sm:$0xff]  ;;  %p1055_p3 = pnand %p1054_p2, %p1048_p13 }
  0x1d   : > { %925 = vmatpush3.bf16.msra.mxu0 %v1043_v2  ;;  %998 = vmatpush3.bf16.msra.mxu1 %v1043_v2  ;;  %v257_v33 = vpack.c.bf16 %v214_v29, %v213_v28  ;;  %v184_v35 = vld [vmem:[%s1191_s7 + $0x58] sm:$0xff]  ;;  %v215_v36 = vld [vmem:[%s1191_s7 + $0x150] sm:$0xff]  ;;  %v185_v38 = vld [vmem:[%s1191_s7 + $0x60] sm:$0xff] }
  0x1e   : > { %926 = vmatprep.subr.bf16.mxu0 %v1044_v6  ;;  %995 = vmatprep.subr.bf16.mxu1 %v1044_v6  ;;  %v216_v37 = vld [vmem:[%s1191_s7 + $0x158] sm:$0xff]  ;;  %v186_v39 = vld [vmem:[%s1191_s7 + $0x68] sm:$0xff]  ;;  %v217_v40 = vld [vmem:[%s1191_s7 + $0x160] sm:$0xff]  ;;  %v242_v42 = vpack.c.bf16 %v184_v35, %v183_v34 }
  0x1f   : > { %v218_v41 = vld [vmem:[%s1191_s7 + $0x168] sm:$0xff]  ;;  %v258_v43 = vpack.c.bf16 %v216_v37, %v215_v36  ;;  %v243_v44 = vpack.c.bf16 %v186_v39, %v185_v38  ;;  %v187_v46 = vld [vmem:[%s1191_s7 + $0x70] sm:$0xff]  ;;  %v188_v47 = vld [vmem:[%s1191_s7 + $0x78] sm:$0xff] }
  0x20   : > { %v259_v45 = vpack.c.bf16 %v218_v41, %v217_v40  ;;  %v219_v48 = vld [vmem:[%s1191_s7 + $0x170] sm:$0xff]  ;;  %v220_v49 = vld [vmem:[%s1191_s7 + $0x178] sm:$0xff]  ;;  %v189_v50 = vld [vmem:[%s1191_s7 + $0x80] sm:$0xff]  ;;  %v244_v54 = vpack.c.bf16 %v188_v47, %v187_v46 }
  0x21   : > { %927 = vmatpush3.bf16.msra.mxu0 %v1044_v6  ;;  %999 = vmatpush3.bf16.msra.mxu1 %v1044_v6  ;;  %v190_v51 = vld [vmem:[%s1191_s7 + $0x88] sm:$0xff]  ;;  %v221_v52 = vld [vmem:[%s1191_s7 + $0x180] sm:$0xff]  ;;  %v260_v55 = vpack.c.bf16 %v220_v49, %v219_v48  ;;  %v191_v58 = vld [vmem:[%s1191_s7 + $0x90] sm:$0xff] }
  0x22   : > { %v222_v53 = vld [vmem:[%s1191_s7 + $0x188] sm:$0xff]  ;;  %v245_v56 = vpack.c.bf16 %v190_v51, %v189_v50  ;;  %v192_v59 = vld [vmem:[%s1191_s7 + $0x98] sm:$0xff]  ;;  %v223_v60 = vld [vmem:[%s1191_s7 + $0x190] sm:$0xff] }
  0x23   : > { %v261_v57 = vpack.c.bf16 %v222_v53, %v221_v52  ;;  %v224_v61 = vld [vmem:[%s1191_s7 + $0x198] sm:$0xff]  ;;  %v193_v62 = vld [vmem:[%s1191_s7 + $0xa0] sm:$0xff]  ;;  %v194_v63 = vld [vmem:[%s1191_s7 + $0xa8] sm:$0xff]  ;;  %v246_v2 = vpack.c.bf16 %v192_v59, %v191_v58 }
  0x24   : > { %929 = vmatmul.mubr.msk.bf16.vlgmr.msra.gmra.mxu0 %vm308_vm0, %v238_v18  ;;  %961 = vmatmul.mubr.msk.bf16.vlgmr.msra.gmra.mxu1 %vm308_vm0, %v254_v19  ;;  %v225_v0 = vld [vmem:[%s1191_s7 + $0x1a0] sm:$0xff]  ;;  %v226_v1 = vld [vmem:[%s1191_s7 + $0x1a8] sm:$0xff]  ;;  %v262_v3 = vpack.c.bf16 %v224_v61, %v223_v60  ;;  %v247_v4 = vpack.c.bf16 %v194_v63, %v193_v62  ;;  %v195_v6 = vld [vmem:[%s1191_s7 + $0xb0] sm:$0xff] }
  0x25   : > { %932 = vmatprep.mubr.msk.bf16.mxu0 %vm308_vm0, %v239_v20  ;;  %964 = vmatprep.mubr.msk.bf16.mxu1 %vm308_vm0, %v255_v21  ;;  %v263_v5 = vpack.c.bf16 %v226_v1, %v225_v0  ;;  %v196_v7 = vld [vmem:[%s1191_s7 + $0xb8] sm:$0xff]  ;;  %v227_v8 = vld [vmem:[%s1191_s7 + $0x1b0] sm:$0xff]  ;;  %v197_v10 = vld [vmem:[%s1191_s7 + $0xc0] sm:$0xff] }
  0x26   : > { %v228_v9 = vld [vmem:[%s1191_s7 + $0x1b8] sm:$0xff]  ;;  %v198_v11 = vld [vmem:[%s1191_s7 + $0xc8] sm:$0xff]  ;;  %v229_v12 = vld [vmem:[%s1191_s7 + $0x1c0] sm:$0xff]  ;;  %v248_v14 = vpack.c.bf16 %v196_v7, %v195_v6 }
  0x27   : > { %v230_v13 = vld [vmem:[%s1191_s7 + $0x1c8] sm:$0xff]  ;;  %v264_v15 = vpack.c.bf16 %v228_v9, %v227_v8  ;;  %v249_v16 = vpack.c.bf16 %v198_v11, %v197_v10  ;;  %v199_v18 = vld [vmem:[%s1191_s7 + $0xd0] sm:$0xff]  ;;  %v200_v19 = vld [vmem:[%s1191_s7 + $0xd8] sm:$0xff] }
  0x28   : > { %v265_v17 = vpack.c.bf16 %v230_v13, %v229_v12  ;;  %v231_v20 = vld [vmem:[%s1191_s7 + $0x1d0] sm:$0xff]  ;;  %v232_v21 = vld [vmem:[%s1191_s7 + $0x1d8] sm:$0xff]  ;;  %v201_v22 = vld [vmem:[%s1191_s7 + $0xe0] sm:$0xff]  ;;  %v250_v26 = vpack.c.bf16 %v200_v19, %v199_v18 }
  0x29   : > { %v202_v23 = vld [vmem:[%s1191_s7 + $0xe8] sm:$0xff]  ;;  %v233_v24 = vld [vmem:[%s1191_s7 + $0x1e0] sm:$0xff]  ;;  %v266_v27 = vpack.c.bf16 %v232_v21, %v231_v20 }
  0x2a   : > { %v234_v25 = vld [vmem:[%s1191_s7 + $0x1e8] sm:$0xff]  ;;  %v251_v28 = vpack.c.bf16 %v202_v23, %v201_v22  ;;  %v1298_v36 = vld [vmem:[%s1483_s2] ss:$0 sm:$0xff] }
  0x2b   : > { %v267_v29 = vpack.c.bf16 %v234_v25, %v233_v24 }
  0x2c   : > { %933 = vmatmul.mubr.msk.bf16.gmra.mxu0 %vm308_vm0, %v240_v30  ;;  %965 = vmatmul.mubr.msk.bf16.gmra.mxu1 %vm308_vm0, %v256_v31  ;;  %v203_v30 = vld [vmem:[%s1191_s7 + $0xf0] sm:$0xff]  ;;  %v204_v31 = vld [vmem:[%s1191_s7 + $0xf8] sm:$0xff] }
  0x2d   : > { %936 = vmatprep.mubr.msk.bf16.mxu0 %vm308_vm0, %v241_v32  ;;  %968 = vmatprep.mubr.msk.bf16.mxu1 %vm308_vm0, %v257_v33  ;;  %v235_v32 = vld [vmem:[%s1191_s7 + $0x1f0] sm:$0xff]  ;;  %v236_v33 = vld [vmem:[%s1191_s7 + $0x1f8] sm:$0xff]  ;;  %v252_v34 = vpack.c.bf16 %v204_v31, %v203_v30 }
  0x2e   : > { %v268_v35 = vpack.c.bf16 %v236_v33, %v235_v32 }
  0x34   : > { %937 = vmatmul.mubr.msk.bf16.gmra.mxu0 %vm308_vm0, %v242_v42  ;;  %969 = vmatmul.mubr.msk.bf16.gmra.mxu1 %vm308_vm0, %v258_v43 }
  0x35   : > { %940 = vmatprep.mubr.msk.bf16.mxu0 %vm308_vm0, %v243_v44  ;;  %972 = vmatprep.mubr.msk.bf16.mxu1 %vm308_vm0, %v259_v45 }
  0x3c   : > { %941 = vmatmul.mubr.msk.bf16.gmra.mxu0 %vm308_vm0, %v244_v54  ;;  %973 = vmatmul.mubr.msk.bf16.gmra.mxu1 %vm308_vm0, %v260_v55 }
  0x3d   : > { %944 = vmatprep.mubr.msk.bf16.mxu0 %vm308_vm0, %v245_v56  ;;  %976 = vmatprep.mubr.msk.bf16.mxu1 %vm308_vm0, %v261_v57 }
  0x44   : > { %945 = vmatmul.mubr.msk.bf16.gmra.mxu0 %vm308_vm0, %v246_v2  ;;  %977 = vmatmul.mubr.msk.bf16.gmra.mxu1 %vm308_vm0, %v262_v3 }
  0x45   : > { %948 = vmatprep.mubr.msk.bf16.mxu0 %vm308_vm0, %v247_v4  ;;  %980 = vmatprep.mubr.msk.bf16.mxu1 %vm308_vm0, %v263_v5 }
  0x4c   : > { %949 = vmatmul.mubr.msk.bf16.gmra.mxu0 %vm308_vm0, %v248_v14  ;;  %981 = vmatmul.mubr.msk.bf16.gmra.mxu1 %vm308_vm0, %v264_v15 }
  0x4d   : > { %952 = vmatprep.mubr.msk.bf16.mxu0 %vm308_vm0, %v249_v16  ;;  %984 = vmatprep.mubr.msk.bf16.mxu1 %vm308_vm0, %v265_v17 }
  0x54   : > { %953 = vmatmul.mubr.msk.bf16.gmra.mxu0 %vm308_vm0, %v250_v26  ;;  %985 = vmatmul.mubr.msk.bf16.gmra.mxu1 %vm308_vm0, %v266_v27 }
  0x55   : > { %956 = vmatprep.mubr.msk.bf16.mxu0 %vm308_vm0, %v251_v28  ;;  %988 = vmatprep.mubr.msk.bf16.mxu1 %vm308_vm0, %v267_v29 }
  0x5c   : > { %957 = vmatmul.mubr.msk.bf16.gmra.mxu0 %vm308_vm0, %v252_v34  ;;  %989 = vmatmul.mubr.msk.bf16.gmra.mxu1 %vm308_vm0, %v268_v35 }
  0xe4   : > { %v930_v37 = vpop.f32.mrf.mxu0  ;;  %v962_v38 = vpop.f32.mrf.mxu1 }
  0xe5   : > { %v448_v39 = vadd.f32 %v930_v37, %v1298_v36  ;;  %v576_v40 = vadd.f32 %v962_v38, %v1298_v36 }
  0xe6   : > { %v439_v41 = vpop.f32.mrf.mxu0  ;;  %v567_v42 = vpop.f32.mrf.mxu1 }
  0xe7   : > { %696 = vst [vmem:[%s1302_s20 + $0x10] sm:$0xff] %v448_v39  ;;  %728 = vst [vmem:[%s1302_s20 + $0x110] sm:$0xff] %v576_v40  ;;  %v440_v43 = vadd.f32 %v1298_v36, %v439_v41  ;;  %v568_v44 = vadd.f32 %v1298_v36, %v567_v42 }
  0xe8   : > { %v931_v45 = vpop.f32.mrf.mxu0  ;;  %v963_v46 = vpop.f32.mrf.mxu1 }
  0xe9   : > { %694 = vst [vmem:[%s1302_s20] sm:$0xff] %v440_v43  ;;  %726 = vst [vmem:[%s1302_s20 + $0x100] sm:$0xff] %v568_v44  ;;  %v451_v47 = vadd.f32 %v931_v45, %v1298_v36  ;;  %v579_v48 = vadd.f32 %v963_v46, %v1298_v36 }
  0xea   : > { %v442_v49 = vpop.f32.mrf.mxu0  ;;  %v570_v50 = vpop.f32.mrf.mxu1 }
  0xeb   : > { %697 = vst [vmem:[%s1302_s20 + $0x18] sm:$0xff] %v451_v47  ;;  %729 = vst [vmem:[%s1302_s20 + $0x118] sm:$0xff] %v579_v48  ;;  %v443_v51 = vadd.f32 %v1298_v36, %v442_v49  ;;  %v571_v52 = vadd.f32 %v1298_v36, %v570_v50 }
  0xec   : > { %v934_v53 = vpop.f32.mrf.mxu0  ;;  %v966_v54 = vpop.f32.mrf.mxu1 }
  0xed   : > { %695 = vst [vmem:[%s1302_s20 + $0x8] sm:$0xff] %v443_v51  ;;  %727 = vst [vmem:[%s1302_s20 + $0x108] sm:$0xff] %v571_v52  ;;  %v464_v55 = vadd.f32 %v934_v53, %v1298_v36  ;;  %v592_v56 = vadd.f32 %v966_v54, %v1298_v36 }
  0xee   : > { %v455_v57 = vpop.f32.mrf.mxu0  ;;  %v583_v58 = vpop.f32.mrf.mxu1 }
  0xef   : > { %700 = vst [vmem:[%s1302_s20 + $0x30] sm:$0xff] %v464_v55  ;;  %732 = vst [vmem:[%s1302_s20 + $0x130] sm:$0xff] %v592_v56  ;;  %v456_v59 = vadd.f32 %v1298_v36, %v455_v57  ;;  %v584_v60 = vadd.f32 %v1298_v36, %v583_v58 }
  0xf0   : > { %v935_v61 = vpop.f32.mrf.mxu0  ;;  %v967_v62 = vpop.f32.mrf.mxu1 }
  0xf1   : > { %698 = vst [vmem:[%s1302_s20 + $0x20] sm:$0xff] %v456_v59  ;;  %730 = vst [vmem:[%s1302_s20 + $0x120] sm:$0xff] %v584_v60  ;;  %v467_v63 = vadd.f32 %v935_v61, %v1298_v36  ;;  %v595_v0 = vadd.f32 %v967_v62, %v1298_v36 }
  0xf2   : > { %v458_v1 = vpop.f32.mrf.mxu0  ;;  %v586_v2 = vpop.f32.mrf.mxu1 }
  0xf3   : > { %701 = vst [vmem:[%s1302_s20 + $0x38] sm:$0xff] %v467_v63  ;;  %733 = vst [vmem:[%s1302_s20 + $0x138] sm:$0xff] %v595_v0  ;;  %v459_v3 = vadd.f32 %v1298_v36, %v458_v1  ;;  %v587_v4 = vadd.f32 %v1298_v36, %v586_v2 }
  0xf4   : > { %v938_v5 = vpop.f32.mrf.mxu0  ;;  %v970_v6 = vpop.f32.mrf.mxu1 }
  0xf5   : > { %699 = vst [vmem:[%s1302_s20 + $0x28] sm:$0xff] %v459_v3  ;;  %731 = vst [vmem:[%s1302_s20 + $0x128] sm:$0xff] %v587_v4  ;;  %v480_v7 = vadd.f32 %v938_v5, %v1298_v36  ;;  %v608_v8 = vadd.f32 %v970_v6, %v1298_v36 }
  0xf6   : > { %v471_v9 = vpop.f32.mrf.mxu0  ;;  %v599_v10 = vpop.f32.mrf.mxu1 }
  0xf7   : > { %704 = vst [vmem:[%s1302_s20 + $0x50] sm:$0xff] %v480_v7  ;;  %736 = vst [vmem:[%s1302_s20 + $0x150] sm:$0xff] %v608_v8  ;;  %v472_v11 = vadd.f32 %v1298_v36, %v471_v9  ;;  %v600_v12 = vadd.f32 %v1298_v36, %v599_v10 }
  0xf8   : > { %v939_v13 = vpop.f32.mrf.mxu0  ;;  %v971_v14 = vpop.f32.mrf.mxu1 }
  0xf9   : > { %702 = vst [vmem:[%s1302_s20 + $0x40] sm:$0xff] %v472_v11  ;;  %734 = vst [vmem:[%s1302_s20 + $0x140] sm:$0xff] %v600_v12  ;;  %v483_v15 = vadd.f32 %v939_v13, %v1298_v36  ;;  %v611_v16 = vadd.f32 %v971_v14, %v1298_v36 }
  0xfa   : > { %v474_v17 = vpop.f32.mrf.mxu0  ;;  %v602_v18 = vpop.f32.mrf.mxu1 }
  0xfb   : > { %705 = vst [vmem:[%s1302_s20 + $0x58] sm:$0xff] %v483_v15  ;;  %737 = vst [vmem:[%s1302_s20 + $0x158] sm:$0xff] %v611_v16  ;;  %v475_v19 = vadd.f32 %v1298_v36, %v474_v17  ;;  %v603_v20 = vadd.f32 %v1298_v36, %v602_v18 }
  0xfc   : > { %v942_v21 = vpop.f32.mrf.mxu0  ;;  %v974_v22 = vpop.f32.mrf.mxu1 }
  0xfd   : > { %703 = vst [vmem:[%s1302_s20 + $0x48] sm:$0xff] %v475_v19  ;;  %735 = vst [vmem:[%s1302_s20 + $0x148] sm:$0xff] %v603_v20  ;;  %v496_v23 = vadd.f32 %v942_v21, %v1298_v36  ;;  %v624_v24 = vadd.f32 %v974_v22, %v1298_v36 }
  0xfe   : > { %v487_v25 = vpop.f32.mrf.mxu0  ;;  %v615_v26 = vpop.f32.mrf.mxu1 }
  0xff   : > { %708 = vst [vmem:[%s1302_s20 + $0x70] sm:$0xff] %v496_v23  ;;  %740 = vst [vmem:[%s1302_s20 + $0x170] sm:$0xff] %v624_v24  ;;  %v488_v27 = vadd.f32 %v1298_v36, %v487_v25  ;;  %v616_v28 = vadd.f32 %v1298_v36, %v615_v26 }
 0x100   : > { %v943_v29 = vpop.f32.mrf.mxu0  ;;  %v975_v30 = vpop.f32.mrf.mxu1 }
 0x101   : > { %706 = vst [vmem:[%s1302_s20 + $0x60] sm:$0xff] %v488_v27  ;;  %738 = vst [vmem:[%s1302_s20 + $0x160] sm:$0xff] %v616_v28  ;;  %v499_v31 = vadd.f32 %v943_v29, %v1298_v36  ;;  %v627_v32 = vadd.f32 %v975_v30, %v1298_v36 }
 0x102   : > { %v490_v33 = vpop.f32.mrf.mxu0  ;;  %v618_v34 = vpop.f32.mrf.mxu1 }
 0x103   : > { %709 = vst [vmem:[%s1302_s20 + $0x78] sm:$0xff] %v499_v31  ;;  %741 = vst [vmem:[%s1302_s20 + $0x178] sm:$0xff] %v627_v32  ;;  %v491_v35 = vadd.f32 %v1298_v36, %v490_v33  ;;  %v619_v37 = vadd.f32 %v1298_v36, %v618_v34 }
 0x104   : > { %v946_v38 = vpop.f32.mrf.mxu0  ;;  %v978_v39 = vpop.f32.mrf.mxu1 }
 0x105   : > { %707 = vst [vmem:[%s1302_s20 + $0x68] sm:$0xff] %v491_v35  ;;  %739 = vst [vmem:[%s1302_s20 + $0x168] sm:$0xff] %v619_v37  ;;  %v512_v40 = vadd.f32 %v946_v38, %v1298_v36  ;;  %v640_v41 = vadd.f32 %v978_v39, %v1298_v36 }
 0x106   : > { %v503_v42 = vpop.f32.mrf.mxu0  ;;  %v631_v43 = vpop.f32.mrf.mxu1 }
 0x107   : > { %712 = vst [vmem:[%s1302_s20 + $0x90] sm:$0xff] %v512_v40  ;;  %744 = vst [vmem:[%s1302_s20 + $0x190] sm:$0xff] %v640_v41  ;;  %v504_v44 = vadd.f32 %v1298_v36, %v503_v42  ;;  %v632_v45 = vadd.f32 %v1298_v36, %v631_v43 }
 0x108   : > { %v947_v46 = vpop.f32.mrf.mxu0  ;;  %v979_v47 = vpop.f32.mrf.mxu1 }
 0x109   : > { %710 = vst [vmem:[%s1302_s20 + $0x80] sm:$0xff] %v504_v44  ;;  %742 = vst [vmem:[%s1302_s20 + $0x180] sm:$0xff] %v632_v45  ;;  %v515_v48 = vadd.f32 %v947_v46, %v1298_v36  ;;  %v643_v49 = vadd.f32 %v979_v47, %v1298_v36 }
 0x10a   : > { %v506_v50 = vpop.f32.mrf.mxu0  ;;  %v634_v51 = vpop.f32.mrf.mxu1 }
 0x10b   : > { %713 = vst [vmem:[%s1302_s20 + $0x98] sm:$0xff] %v515_v48  ;;  %745 = vst [vmem:[%s1302_s20 + $0x198] sm:$0xff] %v643_v49  ;;  %v507_v52 = vadd.f32 %v1298_v36, %v506_v50  ;;  %v635_v53 = vadd.f32 %v1298_v36, %v634_v51 }
 0x10c   : > { %v950_v54 = vpop.f32.mrf.mxu0  ;;  %v982_v55 = vpop.f32.mrf.mxu1 }
 0x10d   : > { %711 = vst [vmem:[%s1302_s20 + $0x88] sm:$0xff] %v507_v52  ;;  %743 = vst [vmem:[%s1302_s20 + $0x188] sm:$0xff] %v635_v53  ;;  %v528_v56 = vadd.f32 %v950_v54, %v1298_v36  ;;  %v656_v57 = vadd.f32 %v982_v55, %v1298_v36 }
 0x10e   : > { %v519_v58 = vpop.f32.mrf.mxu0  ;;  %v647_v59 = vpop.f32.mrf.mxu1 }
 0x10f   : > { %716 = vst [vmem:[%s1302_s20 + $0xb0] sm:$0xff] %v528_v56  ;;  %748 = vst [vmem:[%s1302_s20 + $0x1b0] sm:$0xff] %v656_v57  ;;  %v520_v60 = vadd.f32 %v1298_v36, %v519_v58  ;;  %v648_v61 = vadd.f32 %v1298_v36, %v647_v59 }
 0x110   : > { %v951_v62 = vpop.f32.mrf.mxu0  ;;  %v983_v63 = vpop.f32.mrf.mxu1 }
 0x111   : > { %714 = vst [vmem:[%s1302_s20 + $0xa0] sm:$0xff] %v520_v60  ;;  %746 = vst [vmem:[%s1302_s20 + $0x1a0] sm:$0xff] %v648_v61  ;;  %v531_v0 = vadd.f32 %v951_v62, %v1298_v36  ;;  %v659_v1 = vadd.f32 %v983_v63, %v1298_v36 }
 0x112   : > { %v522_v2 = vpop.f32.mrf.mxu0  ;;  %v650_v3 = vpop.f32.mrf.mxu1 }
 0x113   : > { %717 = vst [vmem:[%s1302_s20 + $0xb8] sm:$0xff] %v531_v0  ;;  %749 = vst [vmem:[%s1302_s20 + $0x1b8] sm:$0xff] %v659_v1  ;;  %v523_v4 = vadd.f32 %v1298_v36, %v522_v2  ;;  %v651_v5 = vadd.f32 %v1298_v36, %v650_v3 }
 0x114   : > { %v954_v6 = vpop.f32.mrf.mxu0  ;;  %v986_v7 = vpop.f32.mrf.mxu1 }
 0x115   : > { %715 = vst [vmem:[%s1302_s20 + $0xa8] sm:$0xff] %v523_v4  ;;  %747 = vst [vmem:[%s1302_s20 + $0x1a8] sm:$0xff] %v651_v5  ;;  %v544_v8 = vadd.f32 %v954_v6, %v1298_v36  ;;  %v672_v9 = vadd.f32 %v986_v7, %v1298_v36 }
 0x116   : > { %v535_v10 = vpop.f32.mrf.mxu0  ;;  %v663_v11 = vpop.f32.mrf.mxu1 }
 0x117   : > { %720 = vst [vmem:[%s1302_s20 + $0xd0] sm:$0xff] %v544_v8  ;;  %752 = vst [vmem:[%s1302_s20 + $0x1d0] sm:$0xff] %v672_v9  ;;  %v536_v12 = vadd.f32 %v1298_v36, %v535_v10  ;;  %v664_v13 = vadd.f32 %v1298_v36, %v663_v11 }
 0x118   : > { %v955_v14 = vpop.f32.mrf.mxu0  ;;  %v987_v15 = vpop.f32.mrf.mxu1 }
 0x119   : > { %718 = vst [vmem:[%s1302_s20 + $0xc0] sm:$0xff] %v536_v12  ;;  %750 = vst [vmem:[%s1302_s20 + $0x1c0] sm:$0xff] %v664_v13  ;;  %v547_v16 = vadd.f32 %v955_v14, %v1298_v36  ;;  %v675_v17 = vadd.f32 %v987_v15, %v1298_v36 }
 0x11a   : > { %v538_v18 = vpop.f32.mrf.mxu0  ;;  %v666_v19 = vpop.f32.mrf.mxu1 }
 0x11b   : > { %721 = vst [vmem:[%s1302_s20 + $0xd8] sm:$0xff] %v547_v16  ;;  %753 = vst [vmem:[%s1302_s20 + $0x1d8] sm:$0xff] %v675_v17  ;;  %v539_v20 = vadd.f32 %v1298_v36, %v538_v18  ;;  %v667_v21 = vadd.f32 %v1298_v36, %v666_v19 }
 0x11c   : > { %v958_v22 = vpop.f32.mrf.mxu0  ;;  %v990_v23 = vpop.f32.mrf.mxu1 }
 0x11d   : > { %719 = vst [vmem:[%s1302_s20 + $0xc8] sm:$0xff] %v539_v20  ;;  %751 = vst [vmem:[%s1302_s20 + $0x1c8] sm:$0xff] %v667_v21  ;;  %v560_v24 = vadd.f32 %v958_v22, %v1298_v36  ;;  %v688_v25 = vadd.f32 %v990_v23, %v1298_v36 }
 0x11e   : > { %v551_v26 = vpop.f32.mrf.mxu0  ;;  %v679_v27 = vpop.f32.mrf.mxu1 }
 0x11f   : > { %724 = vst [vmem:[%s1302_s20 + $0xf0] sm:$0xff] %v560_v24  ;;  %756 = vst [vmem:[%s1302_s20 + $0x1f0] sm:$0xff] %v688_v25  ;;  %v552_v28 = vadd.f32 %v1298_v36, %v551_v26  ;;  %v680_v29 = vadd.f32 %v1298_v36, %v679_v27 }
 0x120   : > { %v959_v30 = vpop.f32.mrf.mxu0  ;;  %v991_v31 = vpop.f32.mrf.mxu1 }
 0x121   : > { %722 = vst [vmem:[%s1302_s20 + $0xe0] sm:$0xff] %v552_v28  ;;  %754 = vst [vmem:[%s1302_s20 + $0x1e0] sm:$0xff] %v680_v29  ;;  %v563_v32 = vadd.f32 %v959_v30, %v1298_v36  ;;  %v691_v33 = vadd.f32 %v991_v31, %v1298_v36 }
 0x122   : > { %v554_v34 = vpop.f32.mrf.mxu0  ;;  %v682_v35 = vpop.f32.mrf.mxu1 }
 0x123   : > { %725 = vst [vmem:[%s1302_s20 + $0xf8] sm:$0xff] %v563_v32  ;;  %757 = vst [vmem:[%s1302_s20 + $0x1f8] sm:$0xff] %v691_v33  ;;  %v555_v37 = vadd.f32 %v1298_v36, %v554_v34  ;;  %v683_v38 = vadd.f32 %v1298_v36, %v682_v35 }
 0x125   : > { %723 = vst [vmem:[%s1302_s20 + $0xe8] sm:$0xff] %v555_v37  ;;  %755 = vst [vmem:[%s1302_s20 + $0x1e8] sm:$0xff] %v683_v38 }
 0x126   : > { %1058 = shalt.err (!%p1055_p3)
}
 0x127   : > { %s1059_s6 = scalar_lea.hbm %s1429_s28, 8192  ;;  %s1063_s9 = scalar_lea.hbm %s1484_s3, 98304 }
 0x128   : > { %p1060_p4 = scmp.ne.s32.totalorder %s1429_s28, %s1059_s6  ;;  %p1064_p9 = scmp.lt.s32.totalorder %s1429_s28, %s1484_s3 }
 0x129   : > { %p1065_p10 = scmp.lt.s32.totalorder %s1063_s9, %s1059_s6 }
 0x12a   : > { %p1061_p7 = pnand %p1060_p4, %p1168_p5 }
 0x12b   : > { %p1066_p11 = por %p1065_p10, %p1064_p9 }
 0x12c   : > { %p1062_p8 = pneg %p1061_p7 }
 0x12e   : > { %p1067_p12 = pnand %p1066_p11, %p1062_p8 }
 0x130   : > { %1070 = shalt.err (!%p1067_p12)
}
 0x131   : > { %s1108_s17 = smov 128   ;;  %s1109_s19 = smov 8  }
 0x132   : > { %1000 = dma.vmem_to_hbm [thread:$0]  (%p1168_p5), %s1431_s25, 8192, %s1429_s28, %s1441_s16, %s1108_s17, %s1108_s17, %s1109_s19  }
 0x133 PF: > { %p1006_p13 = scmp.ge.s32.totalorder %s1105_s15, 2  ;;  %s787_s20 = sand.u32 1, %s1093_s12  }
 0x134   : > { %s788_s24 = scalar_lea.sflag [#allocation3], %s787_s20 }
 0x135   : > { %p1003_p0 = pnand %p1006_p13, %p1172_p6 }
 0x137   : > { %p1004_p1 = pneg %p1003_p0 }
 0x139   : > { %1088 = dma.done.wait (%p1004_p1), %s788_s24, 8192  }
 0x13a   : > { %1090 = vsyncadd (%p1004_p1), %s788_s24, 4294959104  ;;  %p13_p2 = scmp.ge.s32.totalorder %s1155_s18, 14   ;;  %s1487_s12 = smov %s1097_s13 }
 0x13b   : > { %s1488_s13 = smov %s1101_s14  ;;  %s1489_s14 = smov %s1166_s21 }
 0x13c   : > { %s1490_s15 = smov %s1155_s18  ;;  %15 = sbr.rel (!%p13_p2) target bundleno = 3 (0x3), region = 67 }
 0x141   :  { %793 = vsyncpa [#allocation3], 1 }
 0x142   :  { %795 = vsyncpa [#allocation3 + $0x1], 1 }

</bundles_post_ra>
